<compile_context>
chip_gen: v7x
topology: tpu7x:2x2x1
jax: 0.10.0
libtpu: 0.0.40
codegen_flags: <defaults>
</compile_context>

<pallas_src>
import functools

import jax
import jax.numpy as jnp
from jax import lax
from jax.experimental import pallas as pl
from jax.experimental.pallas import tpu as pltpu


# ----------------------------------------------------------------------------
# helpers
# ----------------------------------------------------------------------------
def _round_up(x, m):
    return (x + m - 1) // m * m


def _pick_tile(dim, target, gran):
    """Largest tile <= target that divides `dim` and is a multiple of `gran`.
    Returns `dim` itself (full-extent block, always legal) when dim <= target,
    and None when no divisor exists (caller pads)."""
    if dim <= target:
        return dim
    t = (min(target, dim) // gran) * gran
    while t >= gran:
        if dim % t == 0:
            return t
        t -= gran
    return None


# ----------------------------------------------------------------------------
# Kernel 1: tiled dense projection  y = x @ W + b   (bf16 MXU, f32 accum)
# ----------------------------------------------------------------------------
def _linear_acc_kernel(x_ref, w_ref, b_ref, o_ref, acc_ref):
    # bf16 (or narrower-than-f32) output path: f32 accumulator scratch.
    kk = pl.program_id(2)

    @pl.when(kk == 0)
    def _():
        acc_ref[...] = jnp.zeros_like(acc_ref)

    acc_ref[...] += jnp.dot(x_ref[...].astype(jnp.bfloat16), w_ref[...],
                            preferred_element_type=jnp.float32)

    @pl.when(kk == pl.num_programs(2) - 1)
    def _():
        o_ref[...] = (acc_ref[...] + b_ref[...]).astype(o_ref.dtype)


def _linear_inplace_kernel(x_ref, w_ref, b_ref, o_ref):
    # f32 output path: accumulate directly into the resident output block
    # (its index_map ignores the K axis) -> no scratch, no epilogue copy.
    kk = pl.program_id(2)

    @pl.when(kk == 0)
    def _():
        o_ref[...] = jnp.zeros_like(o_ref)

    o_ref[...] += jnp.dot(x_ref[...].astype(jnp.bfloat16), w_ref[...],
                          preferred_element_type=jnp.float32)

    @pl.when(kk == pl.num_programs(2) - 1)
    def _():
        o_ref[...] += b_ref[...]


def linear(x2d, w_in_out, bias, *, out_dtype,
           tm_target=256, tn_target=1024, tk_target=512):
    """y = x2d @ w_in_out + bias, tiled over (M, N, K). Weights are bf16."""
    m0, k0 = x2d.shape
    k0w, n0 = w_in_out.shape
    assert k0w == k0

    def prep(dim, target, gran):
        t = _pick_tile(dim, target, gran)
        if t is None:                      # no clean divisor: pad to tile size
            t = max(gran, (target // gran) * gran)
            return t, _round_up(dim, t)
        return t, dim

    tm, m = prep(m0, tm_target, 16)        # 16: bf16 sublane-pack friendly
    tk, k = prep(k0, tk_target, 16)
    tn, n = prep(n0, tn_target, 128)

    if m != m0 or k != k0:
        x2d = jnp.pad(x2d, ((0, m - m0), (0, k - k0)))
    if k != k0 or n != n0:
        w_in_out = jnp.pad(w_in_out, ((0, k - k0), (0, n - n0)))
    if n != n0:
        bias = jnp.pad(bias, (0, n - n0))

    grid = (m // tm, n // tn, k // tk)

    out_dtype = jnp.dtype(out_dtype)
    if out_dtype == jnp.dtype(jnp.float32):
        kernel = _linear_inplace_kernel
        scratch = []
    else:
        kernel = _linear_acc_kernel
        scratch = [pltpu.VMEM((tm, tn), jnp.float32)]

    cost = pl.CostEstimate(
        flops=2 * m * n * k + m * n,
        transcendentals=0,
        bytes_accessed=int(m * k * x2d.dtype.itemsize
                           + k * n * w_in_out.dtype.itemsize
                           + n * 4 + m * n * out_dtype.itemsize),
    )

    out = pl.pallas_call(
        kernel,
        out_shape=jax.ShapeDtypeStruct((m, n), out_dtype),
        grid=grid,
        in_specs=[
            pl.BlockSpec((tm, tk), lambda i, j, kk: (i, kk)),
            pl.BlockSpec((tk, tn), lambda i, j, kk: (kk, j)),
            pl.BlockSpec((1, tn), lambda i, j, kk: (0, j)),
        ],
        out_specs=pl.BlockSpec((tm, tn), lambda i, j, kk: (i, j)),
        scratch_shapes=scratch,
        compiler_params=pltpu.CompilerParams(
            dimension_semantics=("parallel", "parallel", "arbitrary"),
        ),
        cost_estimate=cost,
    )(x2d, w_in_out, bias.reshape(1, n).astype(jnp.float32))

    if m != m0 or n != n0:
        out = out[:m0, :n0]
    return out


# ----------------------------------------------------------------------------
# Kernel 2: scaled-dot-product attention.  One (batch, q-tile) per grid step;
#           heads are processed inside the kernel in lane-dense groups so each
#           output store covers >=128 lanes (when head_dim allows).  Q/K/V are
#           read straight out of the fused (B, T, 3E) qkv tensor via BlockSpec
#           index maps (no XLA slices).  Scaling is pre-folded into Q.
# ----------------------------------------------------------------------------
def _attn_kernel(q_ref, k_ref, v_ref, o_ref, *, num_heads, head_dim,
                 heads_per_group):
    # q_ref: (1, tq, E)  k_ref / v_ref: (1, S, E)  o_ref: (1, tq, E)  (bf16)
    q = q_ref[0]
    k = k_ref[0]
    v = v_ref[0]

    for g0 in range(0, num_heads, heads_per_group):
        parts = []
        for h in range(g0, min(g0 + heads_per_group, num_heads)):
            s0 = h * head_dim
            qh = q[:, s0:s0 + head_dim]                       # (tq, Dh) bf16
            kh = k[:, s0:s0 + head_dim]                       # (S,  Dh) bf16
            vh = v[:, s0:s0 + head_dim]                       # (S,  Dh) bf16

            # q . k^T without an explicit transpose (contract last dims).
            s = lax.dot_general(qh, kh, (((1,), (1,)), ((), ())),
                                preferred_element_type=jnp.float32)  # (tq, S)
            m = jnp.max(s, axis=-1, keepdims=True)            # f32 softmax
            e = jnp.exp(s - m)
            denom = jnp.sum(e, axis=-1, keepdims=True)
            p = (e * pl.reciprocal(denom, approx=True)).astype(vh.dtype)
            oh = jnp.dot(p, vh, preferred_element_type=jnp.float32)  # (tq, Dh)
            parts.append(oh)

        grp = parts[0] if len(parts) == 1 else jnp.concatenate(parts, axis=-1)
        c0 = g0 * head_dim
        # Store this head-group immediately -> bounded live ranges, and the
        # store is lane-dense (>=128 lanes) whenever head_dim allows it.
        o_ref[0, :, c0:c0 + grp.shape[-1]] = grp.astype(o_ref.dtype)


def attention(qkv, *, embed_dim, num_heads, head_dim, tq_target=256):
    # qkv: (B, T, 3E) with [Q | K | V] packed along the last dim, heads packed
    # contiguously (Dh-wide chunks) inside each E-wide segment.
    b, t, three_e = qkv.shape
    e = embed_dim
    assert three_e == 3 * e

    tq = _pick_tile(t, tq_target, 16)
    if tq is None:
        # TODO(synk): flash-style KV tiling + masked edge q-tiles for huge,
        #             non-divisible T; full-T fallback is correct but VMEM-heavy.
        tq = t
    grid = (b, t // tq)

    heads_per_group = max(1, min(num_heads, 128 // max(1, head_dim)))
    while num_heads % heads_per_group != 0:
        heads_per_group -= 1

    if e % 128 == 0:
        # Q/K/V selected purely via the last block-axis index -> zero-copy.
        inputs = (qkv, qkv, qkv)
        in_specs = [
            pl.BlockSpec((1, tq, e), lambda bi, qi: (bi, qi, 0)),
            pl.BlockSpec((1, t, e), lambda bi, qi: (bi, 0, 1)),
            pl.BlockSpec((1, t, e), lambda bi, qi: (bi, 0, 2)),
        ]
    else:
        # Toy-shape fallback (E not lane-aligned): slice in XLA once.
        inputs = (qkv[:, :, :e], qkv[:, :, e:2 * e], qkv[:, :, 2 * e:])
        in_specs = [
            pl.BlockSpec((1, tq, e), lambda bi, qi: (bi, qi, 0)),
            pl.BlockSpec((1, t, e), lambda bi, qi: (bi, 0, 0)),
            pl.BlockSpec((1, t, e), lambda bi, qi: (bi, 0, 0)),
        ]

    bytes_per = qkv.dtype.itemsize
    cost = pl.CostEstimate(
        flops=4 * b * num_heads * t * t * head_dim,
        transcendentals=b * num_heads * t * t,
        bytes_accessed=int(bytes_per * 4 * b * t * e),
    )

    kernel = functools.partial(_attn_kernel, num_heads=num_heads,
                               head_dim=head_dim,
                               heads_per_group=heads_per_group)
    return pl.pallas_call(
        kernel,
        out_shape=jax.ShapeDtypeStruct((b, t, e), qkv.dtype),
        grid=grid,
        in_specs=in_specs,
        out_specs=pl.BlockSpec((1, tq, e), lambda bi, qi: (bi, qi, 0)),
        compiler_params=pltpu.CompilerParams(
            dimension_semantics=("parallel", "parallel"),
        ),
        cost_estimate=cost,
    )(*inputs)


# ----------------------------------------------------------------------------
# BartAttention module in JAX, hot paths in Pallas
# ----------------------------------------------------------------------------
class BartAttentionPallas:
    def __init__(self, embed_dim, num_heads, key):
        self.embed_dim = embed_dim
        self.num_heads = num_heads
        self.head_dim = embed_dim // num_heads
        assert self.head_dim * num_heads == embed_dim
        self.scaling = self.head_dim ** (-0.5)

        keys = jax.random.split(key, 8)
        init = lambda kk: 0.02 * jax.random.normal(kk, (embed_dim, embed_dim), jnp.float32)
        binit = lambda kk: 0.01 * jax.random.normal(kk, (embed_dim,), jnp.float32)
        # PyTorch nn.Linear weight is (out, in); store transposed (in, out).
        self.q_w = init(keys[0]).T
        self.q_b = binit(keys[1])
        self.k_w = init(keys[2]).T
        self.k_b = binit(keys[3])
        self.v_w = init(keys[4]).T
        self.v_b = binit(keys[5])
        self.o_w = init(keys[6]).T
        self.o_b = binit(keys[7])

        # Fused QKV parameters (one (E, 3E) matmul), bf16 weights for the MXU,
        # with the 1/sqrt(Dh) scaling folded into the Q columns & bias.
        self.qkv_w = jnp.concatenate(
            [self.q_w * self.scaling, self.k_w, self.v_w], axis=1
        ).astype(jnp.bfloat16)                                      # (E, 3E)
        self.qkv_b = jnp.concatenate(
            [self.q_b * self.scaling, self.k_b, self.v_b]
        ).astype(jnp.float32)                                       # (3E,)
        self.o_w_bf16 = self.o_w.astype(jnp.bfloat16)

    def __call__(self, hidden_states):
        bsz, tgt_len, embed_dim = hidden_states.shape
        x2d = hidden_states.reshape(bsz * tgt_len, embed_dim)

        # One fused projection: (B*T, 3E) in bf16 (halves attention-input DMA).
        qkv = linear(x2d, self.qkv_w, self.qkv_b, out_dtype=jnp.bfloat16)
        qkv = qkv.reshape(bsz, tgt_len, 3 * embed_dim)

        # Attention directly in (B, T, E) layout; Q/K/V picked out of the
        # fused qkv via BlockSpec index maps (no XLA slices, no transposes).
        attn = attention(qkv, embed_dim=embed_dim,
                         num_heads=self.num_heads, head_dim=self.head_dim)

        out = linear(attn.reshape(bsz * tgt_len, embed_dim),
                     self.o_w_bf16, self.o_b, out_dtype=jnp.float32)
        return out.reshape(bsz, tgt_len, embed_dim)

    # pure-JAX f32 reference for validation (mirrors the PyTorch forward)
    def reference(self, hidden_states):
        bsz, tgt_len, embed_dim = hidden_states.shape
        h, dh = self.num_heads, self.head_dim
        q = hidden_states @ self.q_w + self.q_b
        k = hidden_states @ self.k_w + self.k_b
        v = hidden_states @ self.v_w + self.v_b
        q = jnp.transpose(q.reshape(bsz, tgt_len, h, dh), (0, 2, 1, 3)) * self.scaling
        k = jnp.transpose(k.reshape(bsz, tgt_len, h, dh), (0, 2, 1, 3))
        v = jnp.transpose(v.reshape(bsz, tgt_len, h, dh), (0, 2, 1, 3))
        s = jnp.einsum("bhtd,bhsd->bhts", q, k)
        p = jax.nn.softmax(s, axis=-1)
        o = jnp.einsum("bhts,bhsd->bhtd", p, v)
        o = jnp.transpose(o, (0, 2, 1, 3)).reshape(bsz, tgt_len, embed_dim)
        return o @ self.o_w + self.o_b


if __name__ == "__main__":
    key = jax.random.PRNGKey(0)
    k_param, k_input = jax.random.split(key)

    # Small but lane-aligned shapes (E multiple of 128 exercises the zero-copy
    # BlockSpec Q/K/V selection path used for real BART configs).
    B, T, E, H = 2, 16, 128, 4
    attn_mod = BartAttentionPallas(embed_dim=E, num_heads=H, key=k_param)
    hidden_states = jax.random.normal(k_input, (B, T, E), jnp.float32)

    out = jax.block_until_ready(attn_mod(hidden_states))
    ref = jax.block_until_ready(attn_mod.reference(hidden_states))

    assert out.shape == (B, T, E)
    # bf16 matmul operands + approx reciprocal in softmax -> ~1e-2 tolerance
    assert jnp.allclose(out, ref, atol=2e-2, rtol=2e-2), "mismatch vs reference"

    print("KERNEL_OK")
</pallas_src>

<mosaic_0001>
module attributes {stable_mosaic.version = 11 : i64} {
  func.func @_linear_acc_kernel(%arg0: i32, %arg1: i32, %arg2: i32, %arg3: memref<32x128xf32, #tpu.memory_space<vmem>>, %arg4: memref<128x384xbf16, #tpu.memory_space<vmem>>, %arg5: memref<1x384xf32, #tpu.memory_space<vmem>>, %arg6: memref<32x384xbf16, #tpu.memory_space<vmem>>, %arg7: memref<32x384xf32, #tpu.memory_space<vmem>>) attributes {dimension_semantics = [#tpu.dimension_semantics<parallel>, #tpu.dimension_semantics<parallel>, #tpu.dimension_semantics<arbitrary>], iteration_bounds = array<i64: 1, 1, 1>, scalar_prefetch = 0 : i64, scratch_operands = 1 : i64, tpu.core_type = #tpu.core_type<tc>, window_params = [{transform_indices = @transform_0, window_bounds = array<i64: 32, 128>}, {transform_indices = @transform_1, window_bounds = array<i64: 128, 384>}, {transform_indices = @transform_2, window_bounds = array<i64: 1, 384>}, {transform_indices = @transform_3, window_bounds = array<i64: 32, 384>}]} {
    %c0_i32 = arith.constant 0 : i32
    %0 = arith.cmpi eq, %arg2, %c0_i32 : i32
    %1 = arith.extui %0 : i1 to i32
    %c0_i32_0 = arith.constant 0 : i32
    %2 = arith.cmpi ne, %1, %c0_i32_0 : i32
    scf.if %2 {
      %cst_10 = arith.constant 0.000000e+00 : f32
      %13 = vector.broadcast %cst_10 : f32 to vector<32x384xf32>
      %c0_11 = arith.constant 0 : index
      %c0_12 = arith.constant 0 : index
      %14 = vector.load %arg7[%c0_11, %c0_12] : memref<32x384xf32, #tpu.memory_space<vmem>>, vector<32x384xf32>
      tpu.vector_store %arg7[%c0_11, %c0_12], %13 {strides = array<i32>} : memref<32x384xf32, #tpu.memory_space<vmem>>, vector<32x384xf32>,
    } else {
    }
    %c0 = arith.constant 0 : index
    %c0_1 = arith.constant 0 : index
    %3 = vector.load %arg7[%c0, %c0_1] : memref<32x384xf32, #tpu.memory_space<vmem>>, vector<32x384xf32>
    %c0_2 = arith.constant 0 : index
    %c0_3 = arith.constant 0 : index
    %4 = vector.load %arg3[%c0_2, %c0_3] : memref<32x128xf32, #tpu.memory_space<vmem>>, vector<32x128xf32>
    %5 = arith.truncf %4 : vector<32x128xf32> to vector<32x128xbf16>
    %c0_4 = arith.constant 0 : index
    %c0_5 = arith.constant 0 : index
    %6 = vector.load %arg4[%c0_4, %c0_5] : memref<128x384xbf16, #tpu.memory_space<vmem>>, vector<128x384xbf16>
    %cst = arith.constant dense<0.000000e+00> : vector<32x384xf32>
    %7 = tpu.matmul %5, %6, %cst {dimension_numbers = #tpu.dot_dimension_numbers<[1], [0], [0], [1], [0, 0, 1, 1], [], []>} : vector<32x128xbf16>, vector<128x384xbf16>, vector<32x384xf32> -> vector<32x384xf32>
    %8 = arith.addf %3, %7 : vector<32x384xf32>
    %c0_6 = arith.constant 0 : index
    %c0_7 = arith.constant 0 : index
    %9 = vector.load %arg7[%c0_6, %c0_7] : memref<32x384xf32, #tpu.memory_space<vmem>>, vector<32x384xf32>
    tpu.vector_store %arg7[%c0_6, %c0_7], %8 {strides = array<i32>} : memref<32x384xf32, #tpu.memory_space<vmem>>, vector<32x384xf32>,
    %c0_i32_8 = arith.constant 0 : i32
    %10 = arith.cmpi eq, %arg2, %c0_i32_8 : i32
    %11 = arith.extui %10 : i1 to i32
    %c0_i32_9 = arith.constant 0 : i32
    %12 = arith.cmpi ne, %11, %c0_i32_9 : i32
    scf.if %12 {
      %c0_10 = arith.constant 0 : index
      %c0_11 = arith.constant 0 : index
      %13 = vector.load %arg7[%c0_10, %c0_11] : memref<32x384xf32, #tpu.memory_space<vmem>>, vector<32x384xf32>
      %c0_12 = arith.constant 0 : index
      %c0_13 = arith.constant 0 : index
      %14 = vector.load %arg5[%c0_12, %c0_13] : memref<1x384xf32, #tpu.memory_space<vmem>>, vector<1x384xf32>
      %15 = vector.broadcast %14 : vector<1x384xf32> to vector<32x384xf32>
      %16 = arith.addf %13, %15 : vector<32x384xf32>
      %17 = arith.truncf %16 : vector<32x384xf32> to vector<32x384xbf16>
      %c0_14 = arith.constant 0 : index
      %c0_15 = arith.constant 0 : index
      %18 = vector.load %arg6[%c0_14, %c0_15] : memref<32x384xbf16, #tpu.memory_space<vmem>>, vector<32x384xbf16>
      tpu.vector_store %arg6[%c0_14, %c0_15], %17 {strides = array<i32>} : memref<32x384xbf16, #tpu.memory_space<vmem>>, vector<32x384xbf16>,
    } else {
    }
    return
  }
  func.func @transform_0(%arg0: i32, %arg1: i32, %arg2: i32) -> (i32, i32) {
    %c0_i32 = arith.constant 0 : i32
    return %arg0, %arg2 : i32, i32
  }
  func.func @transform_1(%arg0: i32, %arg1: i32, %arg2: i32) -> (i32, i32) {
    %c0_i32 = arith.constant 0 : i32
    return %arg2, %arg1 : i32, i32
  }
  func.func @transform_2(%arg0: i32, %arg1: i32, %arg2: i32) -> (i32, i32) {
    %c0_i32 = arith.constant 0 : i32
    %c0_i32_0 = arith.constant 0 : i32
    return %c0_i32, %arg1 : i32, i32
  }
  func.func @transform_3(%arg0: i32, %arg1: i32, %arg2: i32) -> (i32, i32) {
    %c0_i32 = arith.constant 0 : i32
    return %arg0, %arg1 : i32, i32
  }
}

</mosaic_0001>

<bundles_post_ra>
// kernel: tpu_custom_call.1
= control target key start
LH: loop header
LB: loop body
LE: loop exit
PB: predicated region body
PF: predicated region fallthrough
CT: control target
= control target key end

     0   :  { %8 = vsyncpa [#allocation4], 0  ;;  %s731_s0 = inlined_call_operand.hbm [shape: f32[32,128], index: 0, kind: input, shape index: {}]   ;;  %s732_s1 = inlined_call_operand.hbm [shape: bf16[128,384], index: 1, kind: input, shape index: {}]   ;;  %s733_s2 = inlined_call_operand.vmem [shape: f32[1,384], index: 2, kind: input, shape index: {}]   ;;  %s734_s3 = inlined_call_operand.hbm [shape: bf16[32,384], index: 3, kind: output, shape index: {}]  }
   0x1   :  { %9 = vsyncpa [#allocation7], 0 }
   0x2   :  { %10 = vsyncpa [#allocation5], 0  ;;  %s656_s12 = smov [#allocation3]   ;;  %s584_s16 = scalar_lea.hbm %s731_s0, 512 }
   0x3   :  { %s16_s13 = sshll.u32 %s656_s12, 4  ;;  %p585_p0 = scmp.ne.s32.totalorder %s731_s0, %s584_s16  ;;  %s17_s13 = int_to_ptr.vmem [resolvable:$true] %s16_s13 }
   0x4   :  { %p588_p1 = scmp.lt.u32.totalorder %s584_s16, %s731_s0 }
   0x6   :  { %p590_p2 = pnand %p588_p1, %p585_p0 }
   0x8   :  { %593 = shalt.err (!%p590_p2)
}
   0x9   :  { %s594_s21 = scalar_lea.vmem %s17_s13, 512  ;;  %p599_p4 = scmp.lt.s32.totalorder %s17_s13, %s17_s13 }
   0xa   :  { %p595_p3 = scmp.ne.s32.totalorder %s17_s13, %s594_s21  ;;  %p600_p5 = scmp.lt.s32.totalorder %s594_s21, %s594_s21 }
   0xc   :  { %p601_p6 = por %p600_p5, %p599_p4 }
   0xe   :  { %p602_p7 = pnand %p601_p6, %p595_p3 }
  0x10   :  { %605 = shalt.err (!%p602_p7)
}
  0x11   :  { %s657_s22 = smov 128   ;;  %s658_s23 = smov 8  }
  0x12   :  { %22 = dma.hbm_to_vmem [thread:$0]  %s731_s0, 512, %s17_s13, [#allocation4], %s657_s22, %s657_s22, %s658_s23  }
  0x13   :  { %s659_s26 = smov [#allocation6]   ;;  %s606_s30 = scalar_lea.hbm %s732_s1, 3072 }
  0x14   :  { %s28_s27 = sshll.u32 %s659_s26, 4  ;;  %p607_p8 = scmp.ne.s32.totalorder %s732_s1, %s606_s30  ;;  %s29_s27 = int_to_ptr.vmem [resolvable:$true] %s28_s27 }
  0x15   :  { %p610_p9 = scmp.lt.u32.totalorder %s606_s30, %s732_s1 }
  0x17   :  { %p612_p10 = pnand %p610_p9, %p607_p8 }
  0x19   :  { %615 = shalt.err (!%p612_p10)
}
  0x1a   :  { %s616_s8 = scalar_lea.vmem %s29_s27, 3072  ;;  %p621_p12 = scmp.lt.s32.totalorder %s29_s27, %s29_s27 }
  0x1b   :  { %p617_p11 = scmp.ne.s32.totalorder %s29_s27, %s616_s8  ;;  %p622_p13 = scmp.lt.s32.totalorder %s616_s8, %s616_s8 }
  0x1d   :  { %p623_p0 = por %p622_p13, %p621_p12 }
  0x1f   :  { %p624_p1 = pnand %p623_p0, %p617_p11 }
  0x21   :  { %627 = shalt.err (!%p624_p1)
}
  0x22   :  { %s660_s0 = smov 192   ;;  %s661_s9 = smov 12  }
  0x23   :  { %34 = dma.hbm_to_vmem [thread:$0]  %s732_s1, 3072, %s29_s27, [#allocation7], %s660_s0, %s660_s0, %s661_s9  }
  0x24   :  { %650 = dma.done.wait [#allocation4], 512  }
  0x25   :  { %651 = vsyncadd [#allocation4], 4294966784 }
  0x26   :  { %652 = dma.done.wait [#allocation7], 3072  }
  0x27   :  { %653 = vsyncadd [#allocation7], 4294964224  ;;  %v662_v0 = vmov 0   ;;  %v552_v1 = vld [vmem:[#allocation6 + $0x4] ss:$12 sps:$4 sm:$0xff]   ;;  %v73_v18 = vld [vmem:[#allocation3 + $0x8] sm:$0xff]  ;;  %v381_v31 = vlaneseq }
  0x28   :  { %270 = vmatprep.mubr.bf16.mxu0 %v662_v0  ;;  %v554_v2 = vld [vmem:[#allocation6] ss:$12 sps:$4 sm:$0xff]   ;;  %238 = vmatprep.subr.bf16.mxu0 %v552_v1  ;;  %v555_v3 = vld [vmem:[#allocation6 + $0x1c] ss:$12 sps:$4 sm:$0xff]   ;;  %v557_v4 = vld [vmem:[#allocation6 + $0x18] ss:$12 sps:$4 sm:$0xff]  }
  0x29   :  { %239 = vmatpush1.bf16.msra.mxu0 %v554_v2  ;;  %v558_v5 = vld [vmem:[#allocation6 + $0x8] ss:$12 sps:$4 sm:$0xff]   ;;  %v562_v7 = vld [vmem:[#allocation6 + $0x20] ss:$12 sps:$4 sm:$0xff]   ;;  %v561_v8 = vld [vmem:[#allocation6 + $0x30] ss:$12 sps:$4 sm:$0xff]  }
  0x2a   :  { %240 = vmatprep.subr.bf16.mxu0 %v555_v3  ;;  %v559_v6 = vld [vmem:[#allocation6 + $0x34] ss:$12 sps:$4 sm:$0xff]   ;;  %524 = vmatprep.subr.bf16.mxu1 %v558_v5  ;;  %v563_v9 = vld [vmem:[#allocation6 + $0x4c] ss:$12 sps:$4 sm:$0xff]   ;;  %v570_v12 = vld [vmem:[#allocation6 + $0x50] ss:$12 sps:$4 sm:$0xff]  }
  0x2b   :  { %525 = vmatpush3.bf16.msra.mxu1 %v558_v5  ;;  %v566_v10 = vld [vmem:[#allocation6 + $0x38] ss:$12 sps:$4 sm:$0xff]   ;;  %v565_v11 = vld [vmem:[#allocation6 + $0x48] ss:$12 sps:$4 sm:$0xff]   ;;  %v569_v14 = vld [vmem:[#allocation6 + $0x60] ss:$12 sps:$4 sm:$0xff]  }
  0x2c   :  { %526 = vmatprep.subr.bf16.mxu1 %v562_v7  ;;  %v567_v13 = vld [vmem:[#allocation6 + $0x64] ss:$12 sps:$4 sm:$0xff]   ;;  %v574_v15 = vld [vmem:[#allocation6 + $0x68] ss:$12 sps:$4 sm:$0xff]   ;;  %v578_v20 = vld [vmem:[#allocation6 + $0x80] ss:$12 sps:$4 sm:$0xff]  }
  0x2d   :  { %241 = vmatpush1.bf16.msra.mxu0 %v557_v4  ;;  %v571_v16 = vld [vmem:[#allocation6 + $0x7c] ss:$12 sps:$4 sm:$0xff]   ;;  %v72_v17 = vld [vmem:[#allocation3] sm:$0xff]  ;;  %v579_v25 = vld [vmem:[#allocation6 + $0xac] ss:$12 sps:$4 sm:$0xff]   ;;  %v382_v32 = vshrl.u32 %v381_v31, 7 }
  0x2e   :  { %242 = vmatprep.subr.bf16.mxu0 %v559_v6  ;;  %v573_v19 = vld [vmem:[#allocation6 + $0x78] ss:$12 sps:$4 sm:$0xff]   ;;  %v76_v21 = vpack.c.bf16 %v73_v18, %v72_v17  ;;  %v575_v22 = vld [vmem:[#allocation6 + $0x94] ss:$12 sps:$4 sm:$0xff]   ;;  %v577_v23 = vld [vmem:[#allocation6 + $0x90] ss:$12 sps:$4 sm:$0xff]  }
  0x2f   :  { %527 = vmatpush3.bf16.msra.mxu1 %v562_v7  ;;  %v582_v24 = vld [vmem:[#allocation6 + $0x98] ss:$12 sps:$4 sm:$0xff]   ;;  %v581_v26 = vld [vmem:[#allocation6 + $0xa8] ss:$12 sps:$4 sm:$0xff]   ;;  %v583_v27 = vld [vmem:[#allocation6 + $0xb0] ss:$12 sps:$4 sm:$0xff]  }
  0x30   :  { %528 = vmatprep.subr.bf16.mxu1 %v566_v10  ;;  %540 = vmatprep.mubr.bf16.mxu1 %v76_v21  ;;  %v74_v28 = vld [vmem:[#allocation3 + $0x10] sm:$0xff]  ;;  %v75_v29 = vld [vmem:[#allocation3 + $0x18] sm:$0xff]  ;;  %v383_v33 = vsub.s32 0, %v382_v32  ;;  %v379_v34 = vld [vmem:[%s733_s2] sm:$0x7]  ;;  %v387_v35 = vsub.s32 1, %v382_v32 }
  0x31   :  { %243 = vmatpush1.bf16.msra.mxu0 %v561_v8  ;;  %v77_v30 = vpack.c.bf16 %v75_v29, %v74_v28  ;;  %v391_v36 = vsub.s32 2, %v382_v32  ;;  %s663_s2 = smov [#allocation8]  }
  0x32   :  { %244 = vmatprep.subr.bf16.mxu0 %v563_v9  ;;  %v384_v37 = vrot.slane %v379_v34, %v383_v33  ;;  %v388_v38 = vrot.slane %v379_v34, %v387_v35  ;;  %s461_s13 = sshll.u32 %s663_s2, 4  ;;  %s462_s13 = int_to_ptr.vmem [resolvable:$true] %s461_s13 }
  0x33   :  { %529 = vmatpush3.bf16.msra.mxu1 %v566_v10  ;;  %v392_v40 = vrot.slane %v379_v34, %v391_v36  ;;  %s628_s14 = scalar_lea.vmem %s462_s13, 768  ;;  %p633_p3 = scmp.lt.s32.totalorder %s462_s13, %s462_s13 }
  0x34   :  { %530 = vmatprep.subr.bf16.mxu1 %v570_v12  ;;  %p629_p2 = scmp.ne.s32.totalorder %s462_s13, %s628_s14  ;;  %p634_p4 = scmp.lt.s32.totalorder %s628_s14, %s628_s14 }
  0x35   :  { %245 = vmatpush1.bf16.msra.mxu0 %v565_v11 }
  0x36   :  { %246 = vmatprep.subr.bf16.mxu0 %v567_v13  ;;  %p635_p5 = por %p634_p4, %p633_p3 }
  0x37   :  { %531 = vmatpush3.bf16.msra.mxu1 %v570_v12 }
  0x38   :  { %532 = vmatprep.subr.bf16.mxu1 %v574_v15  ;;  %p636_p6 = pnand %p635_p5, %p629_p2 }
  0x39   :  { %247 = vmatpush1.bf16.msra.mxu0 %v569_v14 }
  0x3a   :  { %248 = vmatprep.subr.bf16.mxu0 %v571_v16 }
  0x3b   :  { %533 = vmatpush3.bf16.msra.mxu1 %v574_v15 }
  0x3c   :  { %534 = vmatprep.subr.bf16.mxu1 %v578_v20 }
  0x3d   :  { %249 = vmatpush1.bf16.msra.mxu0 %v573_v19 }
  0x3e   :  { %250 = vmatprep.subr.bf16.mxu0 %v575_v22 }
  0x3f   :  { %535 = vmatpush3.bf16.msra.mxu1 %v578_v20 }
  0x40   :  { %536 = vmatprep.subr.bf16.mxu1 %v582_v24 }
  0x41   :  { %251 = vmatpush1.bf16.msra.mxu0 %v577_v23 }
  0x42   :  { %252 = vmatprep.subr.bf16.mxu0 %v579_v25 }
  0x43   :  { %537 = vmatpush3.bf16.msra.mxu1 %v582_v24 }
  0x44   :  { %538 = vmatprep.subr.bf16.mxu1 %v583_v27 }
  0x45   :  { %253 = vmatpush1.bf16.msra.mxu0 %v581_v26 }
  0x47   :  { %539 = vmatpush3.bf16.msra.mxu1 %v583_v27 }
  0x48   :  { %271 = vmatmul.mubr.bf16.vlgmr.msra.gmra.mrb[0].mxu0 %v76_v21 }
  0x49   :  { %280 = vmatprep.mubr.bf16.mxu0 %v662_v0 }
  0x4a   :  { %541 = vmatmul.mubr.bf16.vlgmr.msra.gmra.mrb[0].mxu1 %v77_v30 }
  0x50   :  { %281 = vmatmul.mubr.bf16.gmra.mrb[4].mxu0 %v77_v30 }
 0x11b   :  { %v272_v39 = vpop.f32.mrb[0].mxu0 }
 0x11c   :  { %v396_v41 = vadd.f32 %v384_v37, %v272_v39  ;;  %v274_v42 = vpop.f32.mrb[1].mxu0 }
 0x11d   :  { %v397_v43 = vadd.f32 %v388_v38, %v274_v42  ;;  %v276_v44 = vpop.f32.mrb[2].mxu0  ;;  %v542_v47 = vpop.f32.mrb[0].mxu1 }
 0x11e   :  { %v399_v45 = vadd.f32 %v384_v37, %v276_v44  ;;  %v278_v46 = vpop.f32.mrb[3].mxu0  ;;  %v404_v50 = vadd.f32 %v542_v47, %v392_v40  ;;  %v325_v51 = vpop.f32.mrb[1].mxu1 }
 0x11f   :  { %v506_v48 = vpack.c.bf16 %v397_v43, %v396_v41  ;;  %v400_v49 = vadd.f32 %v388_v38, %v278_v46  ;;  %v398_v52 = vadd.f32 %v392_v40, %v325_v51  ;;  %v543_v53 = vpop.f32.mrb[2].mxu1 }
 0x120   :  { %v511_v55 = vpack.c.bf16 %v404_v50, %v404_v50  ;;  %v407_v56 = vadd.f32 %v543_v53, %v392_v40  ;;  %v328_v57 = vpop.f32.mrb[3].mxu1 }
 0x121   :  { %448 = vst [vmem:[#allocation8] sm:$0xff] %v506_v48  ;;  %v508_v54 = vpack.c.bf16 %v400_v49, %v399_v45  ;;  %v507_v58 = vpack.c.bf16 %v398_v52, %v398_v52  ;;  %v401_v59 = vadd.f32 %v392_v40, %v328_v57 }
 0x122   :  { %453 = vst [vmem:[#allocation8 + $0x20] sm:$0xf] %v511_v55  ;;  %v513_v60 = vpack.c.bf16 %v407_v56, %v407_v56 }
 0x123   :  { %450 = vst [vmem:[#allocation8 + $0xc] sm:$0xff] %v508_v54  ;;  %v282_v61 = vpop.f32.mrb[4].mxu0  ;;  %449 = vst [vmem:[#allocation8 + $0x8] sm:$0xf] %v507_v58  ;;  %v509_v63 = vpack.c.bf16 %v401_v59, %v401_v59 }
 0x124   :  { %v402_v62 = vadd.f32 %v384_v37, %v282_v61  ;;  %v284_v0 = vpop.f32.mrb[5].mxu0  ;;  %455 = vst [vmem:[#allocation8 + $0x2c] sm:$0xf] %v513_v60 }
 0x125   :  { %v403_v1 = vadd.f32 %v388_v38, %v284_v0  ;;  %v286_v2 = vpop.f32.mrb[6].mxu0  ;;  %451 = vst [vmem:[#allocation8 + $0x14] sm:$0xf] %v509_v63 }
 0x126   :  { %v405_v3 = vadd.f32 %v384_v37, %v286_v2  ;;  %v288_v4 = vpop.f32.mrb[7].mxu0 }
 0x127   :  { %v510_v5 = vpack.c.bf16 %v403_v1, %v402_v62  ;;  %v406_v6 = vadd.f32 %v388_v38, %v288_v4 }
 0x129   :  { %452 = vst [vmem:[#allocation8 + $0x18] sm:$0xff] %v510_v5  ;;  %v512_v7 = vpack.c.bf16 %v406_v6, %v405_v3 }
 0x12b   :  { %454 = vst [vmem:[#allocation8 + $0x24] sm:$0xff] %v512_v7 }
 0x12c   :  { %639 = shalt.err (!%p636_p6)
}
 0x12d   :  { %s640_s17 = scalar_lea.hbm %s734_s3, 768 }
 0x12e   :  { %p641_p7 = scmp.ne.s32.totalorder %s734_s3, %s640_s17  ;;  %p644_p8 = scmp.lt.u32.totalorder %s640_s17, %s734_s3 }
 0x130   :  { %p646_p9 = pnand %p644_p8, %p641_p7 }
 0x132   :  { %649 = shalt.err (!%p646_p9)
}
 0x133   :  { %467 = dma.vmem_to_hbm [thread:$0]  %s462_s13, 768, %s734_s3, [#allocation5], %s660_s0, %s660_s0, %s661_s9  }
 0x134   :  { %654 = dma.done.wait [#allocation5], 768  }
 0x135   :  { %655 = vsyncadd [#allocation5], 4294966528 }
 0x136   :  { %471 = vsyncpa [#allocation4], 1 }
 0x137   :  { %472 = vsyncpa [#allocation7], 1 }
 0x138   :  { %473 = vsyncpa [#allocation5], 1 }

</bundles_post_ra>
